<compile_context>
chip_gen: v5e
topology: v5e:2x2
jax: 0.10.0
libtpu: 0.0.40
codegen_flags: <defaults>
</compile_context>

<pallas_src>
import functools

import jax
import jax.numpy as jnp
from jax.experimental import pallas as pl
from jax.experimental.pallas import tpu as pltpu

LANES = 128
DEFAULT_MAX_BLOCK_BYTES = 2 * 1024 * 1024   # per-input bytes per grid step
DEFAULT_ACC_ROWS = 512                      # 512*128*4B = 256 KiB f32 accumulator


def _detect_num_tensorcores():
    """Best-effort TensorCore-per-chip count (2 on v7x-style chips, else 1)."""
    try:
        info = pltpu.get_tpu_info()
    except Exception:
        return 1
    for name in ("num_tensorcores", "tensorcore_count", "tensorcores_per_chip",
                 "num_cores", "num_cores_per_chip"):
        n = getattr(info, name, None)
        if isinstance(n, int) and 2 <= n <= 4:
            return n
    return 1


def _mse_sum_kernel(x_ref, t_ref, partial_ref, acc_ref, *,
                    num_slices, steps, block_rows, acc_rows, valid_last_rows):
    """Per-slice sum((x - t)^2) over `steps` blocks of a (rows, 128) slab."""
    c = pl.program_id(0)          # core-slice axis (CORE_PARALLEL on 2-TC chips)
    i = pl.program_id(1)          # reduction axis ("arbitrary")

    num_chunks = -(-block_rows // acc_rows)
    ragged = valid_last_rows != block_rows        # trace-time bool

    def chunk_sq(cidx, nrows):
        lo = cidx * acc_rows
        x = x_ref[pl.ds(lo, nrows), :].astype(jnp.float32)
        t = t_ref[pl.ds(lo, nrows), :].astype(jnp.float32)
        d = x - t
        return d * d

    def accumulate(valid_rows, first):
        # `valid_rows` / `first` are trace-time; every row-slice extent is
        # static and sublane-aligned, so no masking is ever needed.
        if first and valid_rows < acc_rows:
            # Corner case: the first step of this slice is already the short
            # tail block; zero-init so the epilogue reduce sees defined data.
            acc_ref[...] = jnp.zeros(acc_ref.shape, acc_ref.dtype)
            first = False
        for cidx in range(num_chunks):
            lo = cidx * acc_rows
            hi = min(lo + acc_rows, block_rows)
            n = min(valid_rows, hi) - lo
            if n <= 0:
                continue                          # chunk fully past the data
            sq = chunk_sq(cidx, n)
            if first and cidx == 0:
                acc_ref[...] = sq                 # n == acc_rows: write, no RMW
            else:
                acc_ref[pl.ds(0, n), :] += sq

    if steps == 1 and not ragged:
        accumulate(block_rows, True)
    elif not ragged:
        @pl.when(i == 0)
        def _():
            accumulate(block_rows, True)

        @pl.when(i != 0)
        def _():
            accumulate(block_rows, False)
    elif steps == 1:
        # Ragged with one step per slice (only reachable with >=2 slices):
        # every step is a "first" step; only the last slice holds the tail.
        @pl.when(c != num_slices - 1)
        def _():
            accumulate(block_rows, True)

        @pl.when(c == num_slices - 1)
        def _():
            accumulate(valid_last_rows, True)
    else:
        is_tail = jnp.logical_and(c == num_slices - 1, i == steps - 1)

        @pl.when(i == 0)
        def _():
            accumulate(block_rows, True)

        @pl.when(jnp.logical_and(i != 0, jnp.logical_not(is_tail)))
        def _():
            accumulate(block_rows, False)

        @pl.when(jnp.logical_and(i != 0, is_tail))
        def _():
            accumulate(valid_last_rows, False)

    @pl.when(i == steps - 1)
    def _():
        partial_ref[...] = jnp.sum(acc_ref[...]).reshape(1, 1, 1)


def content_loss(input_image, target, *,
                 max_block_bytes=DEFAULT_MAX_BLOCK_BYTES,
                 acc_rows_max=DEFAULT_ACC_ROWS,
                 num_core_slices=None):
    """Returns (input_image, loss) with loss = mean((input_image - target)**2)."""
    assert input_image.shape == target.shape, (input_image.shape, target.shape)
    total = input_image.size
    if total == 0:
        return input_image, jnp.float32(0.0)

    x_flat = input_image.reshape(-1)
    t_flat = target.reshape(-1)

    item_min = min(jnp.dtype(input_image.dtype).itemsize,
                   jnp.dtype(target.dtype).itemsize)
    item_max = max(jnp.dtype(input_image.dtype).itemsize,
                   jnp.dtype(target.dtype).itemsize)
    row_align = 8 * max(1, 4 // max(1, item_min))    # 8 f32 / 16 bf16 / 32 8-bit
    granule = row_align * LANES

    bulk = (total // granule) * granule
    tail = total - bulk

    # Sub-granule residual: tiny (< row_align*128 elems), summed in plain JAX
    # instead of padding (padding would copy both full tensors through HBM).
    tail_sum = jnp.float32(0.0)
    if tail:
        dt = x_flat[bulk:].astype(jnp.float32) - t_flat[bulk:].astype(jnp.float32)
        tail_sum = jnp.sum(dt * dt)

    inv_total = jnp.float32(1.0 / total)
    if bulk == 0:
        return input_image, tail_sum * inv_total

    rows = bulk // LANES                             # multiple of row_align
    x2d = x_flat[:bulk].reshape(rows, LANES)         # no copy, no pad
    t2d = t_flat[:bulk].reshape(rows, LANES)

    # ~max_block_bytes per input per grid step, rounded to the sublane packing.
    max_block_rows = max(
        row_align,
        (max_block_bytes // (LANES * item_max)) // row_align * row_align)
    block_rows = min(max_block_rows, rows)
    num_blocks = pl.cdiv(rows, block_rows)

    # Two core-slices only on multi-TensorCore chips and only when the blocks
    # split evenly (no clamp path, no duplicated DMA, no wasted epilogue work).
    if num_core_slices is None:
        num_core_slices = _detect_num_tensorcores()
    num_slices = 2 if (num_core_slices >= 2 and num_blocks >= 2
                       and num_blocks % 2 == 0) else 1
    steps = num_blocks // num_slices
    valid_last_rows = rows - (num_blocks - 1) * block_rows   # in (0, block_rows]

    # Fixed small f32 accumulator, decoupled from the block size.
    acc_rows = min(acc_rows_max, block_rows)
    acc_rows = max(row_align, (acc_rows // row_align) * row_align)

    kernel = functools.partial(
        _mse_sum_kernel,
        num_slices=num_slices, steps=steps, block_rows=block_rows,
        acc_rows=acc_rows, valid_last_rows=valid_last_rows)

    def in_index_map(c, i):
        return (c * steps + i, 0)

    bytes_in = bulk * (jnp.dtype(input_image.dtype).itemsize
                       + jnp.dtype(target.dtype).itemsize)
    cost = pl.CostEstimate(flops=3 * bulk, transcendentals=0,
                           bytes_accessed=int(bytes_in) + 4 * num_slices)

    core_sem = (getattr(pltpu, "CORE_PARALLEL", "parallel")
                if num_slices > 1 else "arbitrary")

    partials = pl.pallas_call(
        kernel,
        out_shape=jax.ShapeDtypeStruct((num_slices, 1, 1), jnp.float32),
        grid_spec=pltpu.PrefetchScalarGridSpec(
            num_scalar_prefetch=0,
            grid=(num_slices, steps),
            in_specs=[
                pl.BlockSpec((block_rows, LANES), in_index_map),
                pl.BlockSpec((block_rows, LANES), in_index_map),
            ],
            out_specs=pl.BlockSpec((1, 1, 1), lambda c, i: (c, 0, 0)),
            scratch_shapes=[pltpu.VMEM((acc_rows, LANES), jnp.float32)],
        ),
        compiler_params=pltpu.CompilerParams(
            dimension_semantics=(core_sem, "arbitrary"),
            vmem_limit_bytes=32 * 1024 * 1024,
        ),
        cost_estimate=cost,
    )(x2d, t2d)

    loss = (jnp.sum(partials) + tail_sum) * inv_total
    # Forward pass returns the input unchanged; loss is the side output.
    return input_image, loss


if __name__ == "__main__":
    key = jax.random.PRNGKey(0)
    k1, k2, k3, k4 = jax.random.split(key, 4)

    # --- Main check: f32, NCHW (2, 4, 16, 16) ---
    x = jax.random.normal(k1, (2, 4, 16, 16), dtype=jnp.float32)
    target = jax.random.normal(k2, (2, 4, 16, 16), dtype=jnp.float32)
    out, loss = content_loss(x, target)
    out = jax.block_until_ready(out)
    loss = jax.block_until_ready(loss)
    ref_loss = jnp.mean((x - target) ** 2)
    assert jnp.allclose(loss, ref_loss, rtol=1e-5, atol=1e-6), (loss, ref_loss)
    assert jnp.array_equal(out, x)

    # --- bf16 inputs stream at half the bytes; compute is still f32 in-kernel ---
    xb = x.astype(jnp.bfloat16)
    tb = target.astype(jnp.bfloat16)
    _, loss_bf16 = content_loss(xb, tb)
    loss_bf16 = jax.block_until_ready(loss_bf16)
    ref_bf16 = jnp.mean((xb.astype(jnp.float32) - tb.astype(jnp.float32)) ** 2)
    assert jnp.allclose(loss_bf16, ref_bf16, rtol=1e-4, atol=1e-6), (loss_bf16, ref_bf16)

    # --- Exercise multi-block grid + chunked accumulator + ragged tail block
    #     + the plain-JAX sub-granule residual (forced tiny blocks). ---
    x3 = jax.random.normal(k3, (1, 3, 43, 43), dtype=jnp.float32)
    t3 = jax.random.normal(k4, (1, 3, 43, 43), dtype=jnp.float32)
    _, loss3 = content_loss(x3, t3, max_block_bytes=16 * LANES * 4,
                            acc_rows_max=8, num_core_slices=1)
    loss3 = jax.block_until_ready(loss3)
    ref3 = jnp.mean((x3 - t3) ** 2)
    assert jnp.allclose(loss3, ref3, rtol=1e-5, atol=1e-6), (loss3, ref3)

    print("KERNEL_OK")
</pallas_src>

<mosaic_0001>
module attributes {stable_mosaic.version = 11 : i64} {
  func.func @_mse_sum_kernel(%arg0: i32, %arg1: i32, %arg2: memref<16x128xf32, #tpu.memory_space<vmem>>, %arg3: memref<16x128xf32, #tpu.memory_space<vmem>>, %arg4: memref<1x1x1xf32, #tpu.memory_space<vmem>>, %arg5: memref<16x128xf32, #tpu.memory_space<vmem>>) attributes {dimension_semantics = [#tpu.dimension_semantics<arbitrary>, #tpu.dimension_semantics<arbitrary>], iteration_bounds = array<i64: 1, 1>, scalar_prefetch = 0 : i64, scratch_operands = 1 : i64, tpu.core_type = #tpu.core_type<tc>, window_params = [{transform_indices = @transform_0, window_bounds = array<i64: 16, 128>}, {transform_indices = @transform_1, window_bounds = array<i64: 16, 128>}, {transform_indices = @transform_2, window_bounds = array<i64: 1, 1, 1>}]} {
    %c0 = arith.constant 0 : index
    %c0_0 = arith.constant 0 : index
    %0 = vector.load %arg2[%c0, %c0_0] : memref<16x128xf32, #tpu.memory_space<vmem>>, vector<16x128xf32>
    %c0_1 = arith.constant 0 : index
    %c0_2 = arith.constant 0 : index
    %1 = vector.load %arg3[%c0_1, %c0_2] : memref<16x128xf32, #tpu.memory_space<vmem>>, vector<16x128xf32>
    %2 = arith.subf %0, %1 : vector<16x128xf32>
    %3 = arith.mulf %2, %2 : vector<16x128xf32>
    %c0_3 = arith.constant 0 : index
    %c0_4 = arith.constant 0 : index
    %4 = vector.load %arg5[%c0_3, %c0_4] : memref<16x128xf32, #tpu.memory_space<vmem>>, vector<16x128xf32>
    tpu.vector_store %arg5[%c0_3, %c0_4], %3 {strides = array<i32>} : memref<16x128xf32, #tpu.memory_space<vmem>>, vector<16x128xf32>,
    %c0_i32 = arith.constant 0 : i32
    %5 = arith.cmpi eq, %arg1, %c0_i32 : i32
    %6 = arith.extui %5 : i1 to i32
    %c0_i32_5 = arith.constant 0 : i32
    %7 = arith.cmpi ne, %6, %c0_i32_5 : i32
    scf.if %7 {
      %c0_6 = arith.constant 0 : index
      %c0_7 = arith.constant 0 : index
      %8 = vector.load %arg5[%c0_6, %c0_7] : memref<16x128xf32, #tpu.memory_space<vmem>>, vector<16x128xf32>
      %9 = vector.shape_cast %8 : vector<16x128xf32> to vector<1x16x128xf32>
      %cst = arith.constant dense<0.000000e+00> : vector<1xf32>
      %10 = vector.multi_reduction <add>, %9, %cst [1, 2] : vector<1x16x128xf32> to vector<1xf32>
      %11 = vector.shape_cast %10 : vector<1xf32> to vector<1x1x1xf32>
      %12 = vector.extract %11[0, 0, 0] : f32 from vector<1x1x1xf32>
      %13 = vector.broadcast %12 : f32 to vector<1x1x1xf32>
      %c0_8 = arith.constant 0 : index
      %c0_9 = arith.constant 0 : index
      %c0_10 = arith.constant 0 : index
      %14 = vector.load %arg4[%c0_8, %c0_9, %c0_10] : memref<1x1x1xf32, #tpu.memory_space<vmem>>, vector<1x1x1xf32>
      tpu.vector_store %arg4[%c0_8, %c0_9, %c0_10], %13 {strides = array<i32>} : memref<1x1x1xf32, #tpu.memory_space<vmem>>, vector<1x1x1xf32>,
    } else {
    }
    return
  }
  func.func @transform_0(%arg0: i32, %arg1: i32) -> (i32, i32) {
    %c1_i32 = arith.constant 1 : i32
    %0 = arith.muli %arg0, %c1_i32 : i32
    %1 = arith.addi %0, %arg1 : i32
    %c0_i32 = arith.constant 0 : i32
    %c0_i32_0 = arith.constant 0 : i32
    return %1, %c0_i32 : i32, i32
  }
  func.func @transform_1(%arg0: i32, %arg1: i32) -> (i32, i32) {
    %c1_i32 = arith.constant 1 : i32
    %0 = arith.muli %arg0, %c1_i32 : i32
    %1 = arith.addi %0, %arg1 : i32
    %c0_i32 = arith.constant 0 : i32
    %c0_i32_0 = arith.constant 0 : i32
    return %1, %c0_i32 : i32, i32
  }
  func.func @transform_2(%arg0: i32, %arg1: i32) -> (i32, i32, i32) {
    %c0_i32 = arith.constant 0 : i32
    %c0_i32_0 = arith.constant 0 : i32
    %c0_i32_1 = arith.constant 0 : i32
    return %arg0, %c0_i32, %c0_i32_0 : i32, i32, i32
  }
}

</mosaic_0001>

<bundles_post_ra>
// kernel: tpu_custom_call.1
= control target key start
LH: loop header
LB: loop body
LE: loop exit
PB: predicated region body
PF: predicated region fallthrough
CT: control target
= control target key end

     0   :  { %7 = vsyncpa [#allocation4], 0  ;;  %s217_s0 = inlined_call_operand.hbm [shape: f32[16,128], index: 0, kind: input, shape index: {}]   ;;  %s218_s1 = inlined_call_operand.hbm [shape: f32[16,128], index: 1, kind: input, shape index: {}]   ;;  %s219_s2 = inlined_call_operand.hbm [shape: f32[1,1,1], index: 2, kind: output, shape index: {}]  }
   0x1   :  { %8 = vsyncpa [#allocation7], 0 }
   0x2   :  { %9 = vsyncpa [#allocation5], 0  ;;  %s18_s11 = sshll.u32 %s217_s0, 4  ;;  %s188_s12 = smov [#allocation3]   ;;  %s19_s11 = int_to_ptr.hbm [resolvable:$true] %s18_s11 }
   0x3   :  { %s20_s13 = sshll.u32 %s188_s12, 4  ;;  %s35_s16 = sshll.u32 %s218_s1, 4  ;;  %s21_s13 = int_to_ptr.vmem [resolvable:$true] %s20_s13  ;;  %s36_s16 = int_to_ptr.hbm [resolvable:$true] %s35_s16 }
   0x4   :  { %s189_s17 = smov 128   ;;  %s190_s18 = smov 8  }
   0x5   :  { %26 = dma.hbm_to_vmem [thread:$0]  %s19_s11, 256, %s21_s13, [#allocation4], %s189_s17, %s189_s17, %s190_s18  }
   0x6   :  { %s191_s19 = smov [#allocation6]  }
   0x7   :  { %s37_s20 = sshll.u32 %s191_s19, 4  ;;  %s38_s20 = int_to_ptr.vmem [resolvable:$true] %s37_s20 }
   0x8   :  { %43 = dma.hbm_to_vmem [thread:$0]  %s36_s16, 256, %s38_s20, [#allocation7], %s189_s17, %s189_s17, %s190_s18  }
   0x9   :  { %182 = dma.done.wait [#allocation4], 256  }
   0xa   :  { %183 = vsyncadd [#allocation4], 4294967040 }
   0xb   :  { %184 = dma.done.wait [#allocation7], 256  }
   0xc   :  { %185 = vsyncadd [#allocation7], 4294967040  ;;  %v56_v0 = vld [vmem:[#allocation3] sm:$0xff]  ;;  %v57_v1 = vld [vmem:[#allocation3 + $0x8] sm:$0xff]  ;;  %s192_s0 = smov [#allocation8]   ;;  %s92_s23 = sshll.u32 %s219_s2, 4  ;;  %s93_s23 = int_to_ptr.hbm [resolvable:$true] %s92_s23 }
   0xd   :  { %v58_v2 = vld [vmem:[#allocation6] sm:$0xff]  ;;  %v59_v3 = vld [vmem:[#allocation6 + $0x8] sm:$0xff]  ;;  %s90_s1 = sshll.u32 %s192_s0, 4  ;;  %vm83_vm0 = vcmask 0   ;;  %s91_s1 = int_to_ptr.vmem [resolvable:$true] %s90_s1 }
   0xe   :  { %v60_v4 = vsub.f32 %v56_v0, %v58_v2  ;;  %v61_v5 = vsub.f32 %v57_v1, %v59_v3 }
  0x10   :  { %v62_v6 = vmul.f32 %v60_v4, %v60_v4  ;;  %v63_v7 = vmul.f32 %v61_v5, %v61_v5 }
  0x12   :  { %v72_v8 = vadd.f32 %v63_v7, %v62_v6 }
  0x14   :  { %73 = vadd.xlane.f32.xlu0 %v72_v8 }
  0x87   :  { %v74_v9 = vpop.xlane.xlu0 %73 }
  0x88   :  { %v75_v10 = vrot.slane %v74_v9, 4 }
  0x8a   :  { %v76_v11 = vadd.f32 %v75_v10, %v74_v9 }
  0x8c   :  { %v77_v12 = vrot.slane %v76_v11, 2 }
  0x8e   :  { %v78_v13 = vadd.f32 %v77_v12, %v76_v11 }
  0x90   :  { %v79_v14 = vrot.slane %v78_v13, 1 }
  0x92   :  { %v80_v15 = vadd.f32 %v79_v14, %v78_v13 }
  0x94   :  { %103 = vpush %v80_v15 }
  0xc5   :  { %s104_s24 = spop %103 }
  0xc6   :  { %v82_v16 = vstv %s104_s24 }
  0xc7   :  { %84 = vst.msk [vmem:[#allocation8] sm:$0x1] %vm83_vm0, %v82_v16 }
  0xc8   :  { %95 = dma.vmem_to_hbm [thread:$0]  %s91_s1, 16, %s93_s23, [#allocation5]  }
  0xc9   :  { %186 = dma.done.wait [#allocation5], 16  }
  0xca   :  { %187 = vsyncadd [#allocation5], 4294967280 }
  0xcb   :  { %100 = vsyncpa [#allocation4], 1 }
  0xcc   :  { %101 = vsyncpa [#allocation7], 1 }
  0xcd   :  { %102 = vsyncpa [#allocation5], 1 }

</bundles_post_ra>
